<compile_context>
chip_gen: v7x
topology: tpu7x:2x2x1
jax: 0.10.0
libtpu: 0.0.40
codegen_flags: <defaults>
</compile_context>

<pallas_src>
import functools
import math

import jax
import jax.numpy as jnp
from jax.experimental import pallas as pl
from jax.experimental.pallas import tpu as pltpu

# ----------------------------- configuration -----------------------------
BATCH = 2
SENT_LEN = 8
DIMENSION = 32          # word embedding dim
DIM_WPE = 8             # position embedding dim
DIMENSION_C = 16        # number of conv filters
RELATION_TOTAL = 5
WINDOW = 3
WORD_TOTAL = 100
POS_TOTAL_E1 = 40
POS_TOTAL_E2 = 40

D = DIMENSION + 2 * DIM_WPE          # 48
PAD_LEN = WINDOW - 1                 # 2
PIECE_WISE = (3, 3, 2)               # sums to SENT_LEN (static, as in the module)


# ------------------------------- kernel ----------------------------------
def pcnn_kernel(lhs_ref, w_ref, b_ref, o_ref, *, out_len, splits, batch_tile):
    """One batch-tile per grid step.

    lhs_ref : (batch_tile*out_len, window*d) bf16 im2col rows (built in wrapper)
    w_ref   : (window*d, C)                  bf16 im2col-flattened conv weight
                                             w_ref[t*d + j, c] == torch_w[c,0,t,j]
    b_ref   : (1, C)                         f32 conv bias
    o_ref   : (batch_tile*3, C)              f32 tanh(pooled conv); row b*3+k
                                             is piece k of sample b
    """
    s1, s2, _ = splits

    # One MXU push for the whole tile, f32 accumulation.  bf16 only touches
    # the MXU operands; all subsequent vector work is f32 (v5e VPU-friendly).
    acc = jnp.dot(lhs_ref[...], w_ref[...],
                  preferred_element_type=jnp.float32)      # (bt*out_len, C) f32

    # Piecewise max pooling per sample (static offsets), stacked on the
    # sublane axis into a single (batch_tile*3, C) array.
    pieces = []
    for b in range(batch_tile):                            # static, small tile
        r0 = b * out_len
        pieces.append(jnp.max(acc[r0:r0 + s1, :], axis=0, keepdims=True))
        pieces.append(jnp.max(acc[r0 + s1:r0 + s1 + s2, :], axis=0,
                              keepdims=True))
        pieces.append(jnp.max(acc[r0 + s1 + s2:r0 + out_len, :], axis=0,
                              keepdims=True))
    pooled = jnp.concatenate(pieces, axis=0)               # (bt*3, C) f32

    # Bias after pooling (max(x+b) == max(x)+b): one add, ONE tanh, ONE dense
    # full-block store (no per-piece masked partial stores).
    o_ref[...] = jnp.tanh(pooled + b_ref[...])


# ------------------------------ wrapper -----------------------------------
def pcnn_att_forward(word, pos1, pos2, piece_wise, params, *, batch_tile=None):
    word_vec, pos1_emb, pos2_emb, conv_w, conv_b = params
    batch, sent_len = word.shape
    c = conv_w.shape[0]

    assert sum(piece_wise) == sent_len, "piece_wise must cover the sentence"
    out_len = sent_len + PAD_LEN                         # conv output length
    # new_piece_wise: last piece grows by pad_len (as in the torch code).
    splits = (piece_wise[0], piece_wise[1], piece_wise[2] + PAD_LEN)
    assert sum(splits) == out_len, "splits must cover the conv output"

    if batch_tile is None:
        batch_tile = batch                               # whole batch, one step
    assert batch % batch_tile == 0
    n_tiles = batch // batch_tile
    if n_tiles > 1:
        # (8,128) rule kicks in once a block no longer spans the full array.
        assert (batch_tile * out_len) % 8 == 0 and (batch_tile * 3) % 8 == 0

    # --- plain-JAX glue: embedding lookups + concat + pad + im2col ---------
    emb_w = jnp.take(word_vec, word, axis=0)             # (B, S, dim)
    emb_p1 = jnp.take(pos1_emb, pos1, axis=0)            # (B, S, wpe)
    emb_p2 = jnp.take(pos2_emb, pos2, axis=0)            # (B, S, wpe)
    q = jnp.concatenate([emb_w, emb_p1, emb_p2], axis=2)  # (B, S, d) f32

    # Same zero padding as Conv2d padding=(window-1, 0) along the seq axis.
    q_pad = jnp.pad(q, ((0, 0), (PAD_LEN, PAD_LEN), (0, 0)))  # (B, h, d)

    # Wrapper-side im2col (fused by XLA): row (b, l) is
    # [q_pad[b, l], q_pad[b, l+1], ..., q_pad[b, l+window-1]].
    lhs = jnp.concatenate([q_pad[:, t:t + out_len, :] for t in range(WINDOW)],
                          axis=-1)                       # (B, out_len, window*d)
    lhs = lhs.reshape(batch * out_len, WINDOW * D).astype(jnp.bfloat16)

    # Torch conv weight (C, 1, window, d) -> im2col layout (window*d, C), bf16.
    w_k = jnp.transpose(conv_w[:, 0, :, :].reshape(c, WINDOW * D)).astype(
        jnp.bfloat16)
    b_k = conv_b.reshape(1, c).astype(jnp.float32)

    kernel = functools.partial(pcnn_kernel, out_len=out_len, splits=splits,
                               batch_tile=batch_tile)

    out = pl.pallas_call(
        kernel,
        out_shape=jax.ShapeDtypeStruct((batch * 3, c), jnp.float32),
        grid=(n_tiles,),
        in_specs=[
            pl.BlockSpec((batch_tile * out_len, WINDOW * D), lambda i: (i, 0)),
            pl.BlockSpec((WINDOW * D, c), lambda i: (0, 0)),
            pl.BlockSpec((1, c), lambda i: (0, 0)),
        ],
        out_specs=pl.BlockSpec((batch_tile * 3, c), lambda i: (i, 0)),
        compiler_params=pltpu.CompilerParams(
            dimension_semantics=("parallel",)),          # v7x: both TCs at scale
    )(lhs, w_k, b_k)

    # Row b*3+k is piece k of sample b -> (B, 3C) with piece-major lanes,
    # matching torch.cat((p1, p2, p3), dim=1).
    return out.reshape(batch, 3 * c)


# --------------------------- pure-JAX reference ---------------------------
def reference_forward(word, pos1, pos2, piece_wise, params):
    word_vec, pos1_emb, pos2_emb, conv_w, conv_b = params
    emb_w = jnp.take(word_vec, word, axis=0)
    emb_p1 = jnp.take(pos1_emb, pos1, axis=0)
    emb_p2 = jnp.take(pos2_emb, pos2, axis=0)
    q = jnp.concatenate([emb_w, emb_p1, emb_p2], axis=2)    # (B, S, d)
    x = q[:, None, :, :]                                     # NCHW, C=1
    c = jax.lax.conv_general_dilated(
        x, conv_w, window_strides=(1, 1),
        padding=((PAD_LEN, PAD_LEN), (0, 0)),
        dimension_numbers=("NCHW", "OIHW", "NCHW"),
        precision=jax.lax.Precision.HIGHEST)                 # (B, C, L, 1)
    c = c[..., 0] + conv_b[None, :, None]                    # (B, C, L)
    s1, s2 = piece_wise[0], piece_wise[1]
    p1 = jnp.max(c[:, :, :s1], axis=2)
    p2 = jnp.max(c[:, :, s1:s1 + s2], axis=2)
    p3 = jnp.max(c[:, :, s1 + s2:], axis=2)
    p = jnp.concatenate([p1, p2, p3], axis=1)
    return jnp.tanh(p)


# --------------------------------- main -----------------------------------
if __name__ == "__main__":
    key = jax.random.PRNGKey(0)
    kw, kp1, kp2, kcw, kcb, kiw, kip1, kip2 = jax.random.split(key, 8)

    con = math.sqrt(6.0 / (3 * DIMENSION_C + RELATION_TOTAL))
    con1 = math.sqrt(6.0 / ((DIM_WPE + DIMENSION) * WINDOW))

    # Deterministic synthetic parameters (shapes match the module __init__).
    word_vec = 0.1 * jax.random.normal(kw, (WORD_TOTAL, DIMENSION), jnp.float32)
    pos1_emb = jax.random.uniform(kp1, (POS_TOTAL_E1, DIM_WPE),
                                  minval=-con1, maxval=con1, dtype=jnp.float32)
    pos2_emb = jax.random.uniform(kp2, (POS_TOTAL_E2, DIM_WPE),
                                  minval=-con1, maxval=con1, dtype=jnp.float32)
    conv_w = jax.random.uniform(kcw, (DIMENSION_C, 1, WINDOW, D),
                                minval=-con1, maxval=con1, dtype=jnp.float32)
    conv_b = jax.random.uniform(kcb, (DIMENSION_C,),
                                minval=-con, maxval=con, dtype=jnp.float32)
    params = (word_vec, pos1_emb, pos2_emb, conv_w, conv_b)

    # Deterministic inputs.
    word = jax.random.randint(kiw, (BATCH, SENT_LEN), 0, WORD_TOTAL, jnp.int32)
    pos1 = jax.random.randint(kip1, (BATCH, SENT_LEN), 0, POS_TOTAL_E1, jnp.int32)
    pos2 = jax.random.randint(kip2, (BATCH, SENT_LEN), 0, POS_TOTAL_E2, jnp.int32)

    g = pcnn_att_forward(word, pos1, pos2, PIECE_WISE, params)
    g = jax.block_until_ready(g)

    g_ref = reference_forward(word, pos1, pos2, PIECE_WISE, params)
    g_ref = jax.block_until_ready(g_ref)

    assert g.shape == (BATCH, 3 * DIMENSION_C)
    # bf16 MXU operands vs f32 HIGHEST-precision reference.
    assert jnp.allclose(g, g_ref, atol=5e-3, rtol=5e-3), (
        f"max abs diff {jnp.max(jnp.abs(g - g_ref))}")

    print("KERNEL_OK")
</pallas_src>

<mosaic_0001>
module attributes {stable_mosaic.version = 11 : i64} {
  func.func @pcnn_kernel(%arg0: i32, %arg1: memref<20x144xbf16, #tpu.memory_space<vmem>>, %arg2: memref<144x16xbf16, #tpu.memory_space<vmem>>, %arg3: memref<1x16xf32, #tpu.memory_space<vmem>>, %arg4: memref<6x16xf32, #tpu.memory_space<vmem>>) attributes {dimension_semantics = [#tpu.dimension_semantics<parallel>], iteration_bounds = array<i64: 1>, scalar_prefetch = 0 : i64, scratch_operands = 0 : i64, tpu.core_type = #tpu.core_type<tc>, window_params = [{transform_indices = @transform_0, window_bounds = array<i64: 20, 144>}, {pipeline_mode = #tpu.pipeline_mode<synchronous>, transform_indices = @transform_1, window_bounds = array<i64: 144, 16>}, {pipeline_mode = #tpu.pipeline_mode<synchronous>, transform_indices = @transform_2, window_bounds = array<i64: 1, 16>}, {transform_indices = @transform_3, window_bounds = array<i64: 6, 16>}]} {
    %c0 = arith.constant 0 : index
    %c0_0 = arith.constant 0 : index
    %0 = vector.load %arg1[%c0, %c0_0] : memref<20x144xbf16, #tpu.memory_space<vmem>>, vector<20x144xbf16>
    %c0_1 = arith.constant 0 : index
    %c0_2 = arith.constant 0 : index
    %1 = vector.load %arg2[%c0_1, %c0_2] : memref<144x16xbf16, #tpu.memory_space<vmem>>, vector<144x16xbf16>
    %cst = arith.constant dense<0.000000e+00> : vector<20x16xf32>
    %2 = tpu.matmul %0, %1, %cst {dimension_numbers = #tpu.dot_dimension_numbers<[1], [0], [0], [1], [0, 0, 1, 1], [], []>} : vector<20x144xbf16>, vector<144x16xbf16>, vector<20x16xf32> -> vector<20x16xf32>
    %3 = vector.extract_strided_slice %2 {offsets = [0, 0], sizes = [3, 16], strides = [1, 1]} : vector<20x16xf32> to vector<3x16xf32>
    %cst_3 = arith.constant dense<0xFF800000> : vector<16xf32>
    %4 = vector.multi_reduction <maximumf>, %3, %cst_3 [0] : vector<3x16xf32> to vector<16xf32>
    %5 = vector.shape_cast %4 : vector<16xf32> to vector<1x16xf32>
    %6 = vector.extract_strided_slice %2 {offsets = [3, 0], sizes = [3, 16], strides = [1, 1]} : vector<20x16xf32> to vector<3x16xf32>
    %cst_4 = arith.constant dense<0xFF800000> : vector<16xf32>
    %7 = vector.multi_reduction <maximumf>, %6, %cst_4 [0] : vector<3x16xf32> to vector<16xf32>
    %8 = vector.shape_cast %7 : vector<16xf32> to vector<1x16xf32>
    %9 = vector.extract_strided_slice %2 {offsets = [6, 0], sizes = [4, 16], strides = [1, 1]} : vector<20x16xf32> to vector<4x16xf32>
    %cst_5 = arith.constant dense<0xFF800000> : vector<16xf32>
    %10 = vector.multi_reduction <maximumf>, %9, %cst_5 [0] : vector<4x16xf32> to vector<16xf32>
    %11 = vector.shape_cast %10 : vector<16xf32> to vector<1x16xf32>
    %12 = vector.extract_strided_slice %2 {offsets = [10, 0], sizes = [3, 16], strides = [1, 1]} : vector<20x16xf32> to vector<3x16xf32>
    %cst_6 = arith.constant dense<0xFF800000> : vector<16xf32>
    %13 = vector.multi_reduction <maximumf>, %12, %cst_6 [0] : vector<3x16xf32> to vector<16xf32>
    %14 = vector.shape_cast %13 : vector<16xf32> to vector<1x16xf32>
    %15 = vector.extract_strided_slice %2 {offsets = [13, 0], sizes = [3, 16], strides = [1, 1]} : vector<20x16xf32> to vector<3x16xf32>
    %cst_7 = arith.constant dense<0xFF800000> : vector<16xf32>
    %16 = vector.multi_reduction <maximumf>, %15, %cst_7 [0] : vector<3x16xf32> to vector<16xf32>
    %17 = vector.shape_cast %16 : vector<16xf32> to vector<1x16xf32>
    %18 = vector.extract_strided_slice %2 {offsets = [16, 0], sizes = [4, 16], strides = [1, 1]} : vector<20x16xf32> to vector<4x16xf32>
    %cst_8 = arith.constant dense<0xFF800000> : vector<16xf32>
    %19 = vector.multi_reduction <maximumf>, %18, %cst_8 [0] : vector<4x16xf32> to vector<16xf32>
    %20 = vector.shape_cast %19 : vector<16xf32> to vector<1x16xf32>
    %21 = tpu.concatenate %5, %8, %11, %14, %17, %20 in 0 : vector<1x16xf32>, vector<1x16xf32>, vector<1x16xf32>, vector<1x16xf32>, vector<1x16xf32>, vector<1x16xf32> -> vector<6x16xf32>
    %c0_9 = arith.constant 0 : index
    %c0_10 = arith.constant 0 : index
    %22 = vector.load %arg3[%c0_9, %c0_10] : memref<1x16xf32, #tpu.memory_space<vmem>>, vector<1x16xf32>
    %23 = vector.broadcast %22 : vector<1x16xf32> to vector<6x16xf32>
    %24 = arith.addf %21, %23 : vector<6x16xf32>
    %25 = math.tanh %24 : vector<6x16xf32>
    %c0_11 = arith.constant 0 : index
    %c0_12 = arith.constant 0 : index
    %26 = vector.load %arg4[%c0_11, %c0_12] : memref<6x16xf32, #tpu.memory_space<vmem>>, vector<6x16xf32>
    tpu.vector_store %arg4[%c0_11, %c0_12], %25 {strides = array<i32>} : memref<6x16xf32, #tpu.memory_space<vmem>>, vector<6x16xf32>,
    return
  }
  func.func @transform_0(%arg0: i32) -> (i32, i32) {
    %c0_i32 = arith.constant 0 : i32
    %c0_i32_0 = arith.constant 0 : i32
    return %arg0, %c0_i32 : i32, i32
  }
  func.func @transform_1(%arg0: i32) -> (i32, i32) {
    %c0_i32 = arith.constant 0 : i32
    %c0_i32_0 = arith.constant 0 : i32
    %c0_i32_1 = arith.constant 0 : i32
    return %c0_i32, %c0_i32_0 : i32, i32
  }
  func.func @transform_2(%arg0: i32) -> (i32, i32) {
    %c0_i32 = arith.constant 0 : i32
    %c0_i32_0 = arith.constant 0 : i32
    %c0_i32_1 = arith.constant 0 : i32
    return %c0_i32, %c0_i32_0 : i32, i32
  }
  func.func @transform_3(%arg0: i32) -> (i32, i32) {
    %c0_i32 = arith.constant 0 : i32
    %c0_i32_0 = arith.constant 0 : i32
    return %arg0, %c0_i32 : i32, i32
  }
}

</mosaic_0001>

<bundles_post_ra>
// kernel: tpu_custom_call.1
= control target key start
LH: loop header
LB: loop body
LE: loop exit
PB: predicated region body
PF: predicated region fallthrough
CT: control target
= control target key end

     0   :  { %v323_v1 = vmov 0   ;;  %vm106_vm0 = vcmask 130048   ;;  %s396_s0 = inlined_call_operand.vmem [shape: bf16[20,144], index: 0, kind: input, shape index: {}]   ;;  %s397_s1 = inlined_call_operand.vmem [shape: bf16[144,16], index: 1, kind: input, shape index: {}]   ;;  %s398_s2 = inlined_call_operand.vmem [shape: f32[1,16], index: 2, kind: input, shape index: {}]   ;;  %s399_s3 = inlined_call_operand.hbm [shape: f32[6,16], index: 3, kind: output, shape index: {}]  }
   0x1   :  { %v283_v0 = vld [vmem:[%s397_s1] sm:$0xff]   ;;  %113 = vmatprep.subr.bf16.mxu0 %v323_v1  ;;  %263 = vmatprep.subr.bf16.mxu1 %v323_v1  ;;  %v284_v2 = vld [vmem:[%s397_s1 + $0x8] sm:$0xff]   ;;  %v285_v3 = vld [vmem:[%s397_s1 + $0x10] sm:$0xff]  }
   0x2   :  { %114 = vmatpush1.bf16.msra.mxu0 %v283_v0  ;;  %272 = vmatpush1.bf16.msra.mxu1 %v283_v0  ;;  %v286_v4 = vld [vmem:[%s397_s1 + $0x18] sm:$0xff]   ;;  %v294_v5 = vld [vmem:[%s396_s0 + $0x4] ss:$8 sps:$4 sm:$0xff]   ;;  %v18_v6 = vld [vmem:[%s396_s0 + $0x10] sm:$0x33] }
   0x3   :  { %115 = vmatprep.subr.bf16.mxu0 %v323_v1  ;;  %264 = vmatprep.subr.bf16.mxu1 %v323_v1 }
   0x6   :  { %116 = vmatpush1.bf16.msra.mxu0 %v284_v2  ;;  %273 = vmatpush1.bf16.msra.mxu1 %v284_v2 }
   0x7   :  { %117 = vmatprep.subr.bf16.mxu0 %v323_v1  ;;  %265 = vmatprep.subr.bf16.mxu1 %v323_v1 }
   0xa   :  { %118 = vmatpush1.bf16.msra.mxu0 %v285_v3  ;;  %274 = vmatpush1.bf16.msra.mxu1 %v285_v3 }
   0xb   :  { %8 = vsyncpa [#allocation3], 0  ;;  %119 = vmatprep.subr.bf16.mxu0 %v323_v1  ;;  %266 = vmatprep.subr.bf16.mxu1 %v323_v1  ;;  %v250_v7 = vcombine.high %v18_v6, %v18_v6  ;;  %v287_v8 = vld [vmem:[%s397_s1 + $0x20] sm:$0xff]   ;;  %v288_v9 = vld [vmem:[%s397_s1 + $0x28] sm:$0xff]   ;;  %v249_v14 = vcombine.low %v18_v6, %v18_v6  ;;  %vm161_vm1 = vcmask 124928   ;;  %vm169_vm2 = vcmask 128003  }
   0xc   :  { %260 = vmatprep.mubr.msk.bf16.mxu0 %vm106_vm0, %v294_v5  ;;  %v289_v10 = vld [vmem:[%s397_s1 + $0x30] sm:$0xff]   ;;  %v290_v11 = vld [vmem:[%s397_s1 + $0x38] sm:$0xff]   ;;  %v291_v12 = vld [vmem:[%s397_s1 + $0x40] sm:$0xff]   ;;  %vm204_vm3 = vcmask 125952   ;;  %vm177_vm4 = vcmask 130054   ;;  %vm179_vm5 = vcmask 123904  }
   0xd   :  { %261 = vmatprep.mubr.msk.bf16.mxu1 %vm106_vm0, %v250_v7  ;;  %v292_v13 = vld [vmem:[%s396_s0] ss:$8 sps:$4 sm:$0xff]   ;;  %vm188_vm6 = vcmask 126978   ;;  %vm196_vm7 = vcmask 130053   ;;  %vm212_vm8 = vcmask 1040384   ;;  %vm214_vm9 = vcmask 1041408  }
   0xe   :  { %120 = vmatpush1.bf16.msra.mxu0 %v286_v4  ;;  %275 = vmatpush1.bf16.msra.mxu1 %v286_v4  ;;  %vm216_vm10 = vcmask 1042432   ;;  %vm218_vm11 = vcmask 1043456   ;;  %vm220_vm12 = vcmask 1044480   ;;  %v262_v6 = vld [vmem:[%s398_s2] ss:$0 sm:$0xff]  ;;  %s324_s9 = smov [#allocation2]  }
   0xf   :  { %121 = vmatprep.subr.bf16.mxu0 %v323_v1  ;;  %267 = vmatprep.subr.bf16.mxu1 %v323_v1  ;;  %s239_s10 = sshll.u32 %s324_s9, 4  ;;  %vm231_vm13 = vcmask 128000   ;;  %s240_s10 = int_to_ptr.vmem [resolvable:$true] %s239_s10 }
  0x10   :  { %s299_s11 = scalar_lea.vmem %s240_s10, 128  ;;  %p304_p1 = scmp.lt.s32.totalorder %s240_s10, %s240_s10 }
  0x11   :  { %p300_p0 = scmp.ne.s32.totalorder %s240_s10, %s299_s11  ;;  %p305_p2 = scmp.lt.s32.totalorder %s299_s11, %s299_s11 }
  0x12   :  { %122 = vmatpush1.bf16.msra.mxu0 %v287_v8  ;;  %276 = vmatpush1.bf16.msra.mxu1 %v287_v8 }
  0x13   :  { %123 = vmatprep.subr.bf16.mxu0 %v323_v1  ;;  %268 = vmatprep.subr.bf16.mxu1 %v323_v1  ;;  %p306_p3 = por %p305_p2, %p304_p1 }
  0x15   :  { %p307_p4 = pnand %p306_p3, %p300_p0 }
  0x16   :  { %124 = vmatpush1.bf16.msra.mxu0 %v288_v9  ;;  %277 = vmatpush1.bf16.msra.mxu1 %v288_v9 }
  0x17   :  { %125 = vmatprep.subr.bf16.mxu0 %v323_v1  ;;  %269 = vmatprep.subr.bf16.mxu1 %v323_v1 }
  0x1a   :  { %126 = vmatpush1.bf16.msra.mxu0 %v289_v10  ;;  %278 = vmatpush1.bf16.msra.mxu1 %v289_v10 }
  0x1b   :  { %127 = vmatprep.subr.bf16.mxu0 %v323_v1  ;;  %270 = vmatprep.subr.bf16.mxu1 %v323_v1 }
  0x1e   :  { %128 = vmatpush1.bf16.msra.mxu0 %v290_v11  ;;  %279 = vmatpush1.bf16.msra.mxu1 %v290_v11 }
  0x1f   :  { %129 = vmatprep.subr.bf16.mxu0 %v323_v1  ;;  %271 = vmatprep.subr.bf16.mxu1 %v323_v1 }
  0x22   :  { %130 = vmatpush1.bf16.msra.mxu0 %v291_v12  ;;  %280 = vmatpush1.bf16.msra.mxu1 %v291_v12 }
  0x25   :  { %146 = vmatmul.mubr.bf16.vlgmr.msra.gmra.mrb[0].mxu0 %v292_v13  ;;  %154 = vmatmul.mubr.bf16.vlgmr.msra.gmra.mrb[0].mxu1 %v249_v14 }
  0xf8   :  { %v147_v15 = vpop.f32.mrb[0].mxu0  ;;  %v155_v16 = vpop.f32.mrb[0].mxu1 }
  0xf9   :  { %v162_v17 = vsel %vm161_vm1, %v147_v15, -inf  ;;  %v170_v18 = vsel %vm169_vm2, %v147_v15, -inf  ;;  %v149_v19 = vpop.f32.mrb[1].mxu0  ;;  %v205_v20 = vsel %vm204_vm3, %v155_v16, -inf  ;;  %v157_v21 = vpop.f32.mrb[1].mxu1  ;;  %v178_v27 = vsel %vm177_vm4, %v147_v15, -inf }
  0xfa   :  { %v163_v22 = vrot.slane %v162_v17, 4  ;;  %v171_v23 = vrot.slane %v170_v18, 4  ;;  %v206_v24 = vrot.slane %v205_v20, 4  ;;  %v150_v25 = vpop.f32.mrb[2].mxu0  ;;  %v158_v26 = vpop.f32.mrb[2].mxu1 }
  0xfb   :  { %v180_v28 = vsel %vm179_vm5, %v150_v25, -inf  ;;  %v189_v29 = vsel %vm188_vm6, %v150_v25, -inf  ;;  %v197_v30 = vsel %vm196_vm7, %v150_v25, -inf  ;;  %v152_v31 = vpop.f32.mrb[3].mxu0  ;;  %v159_v32 = vpop.f32.mrb[3].mxu1 }
  0xfc   :  { %v164_v33 = vmax.f32 %v162_v17, %v163_v22  ;;  %v172_v34 = vmax.f32 %v170_v18, %v171_v23  ;;  %v207_v35 = vmax.f32 %v205_v20, %v206_v24  ;;  %v181_v36 = vmax.f32 %v178_v27, %v180_v28 }
  0xfd   :  { %v190_v37 = vrot.slane %v189_v29, 4  ;;  %v198_v38 = vrot.slane %v197_v30, 4 }
  0xfe   :  { %v165_v39 = vrot.slane %v164_v33, 2  ;;  %v173_v40 = vrot.slane %v172_v34, 2  ;;  %v182_v41 = vrot.slane %v181_v36, 4  ;;  %v208_v42 = vrot.slane %v207_v35, 2 }
  0xff   :  { %v191_v43 = vmax.f32 %v189_v29, %v190_v37  ;;  %v199_v44 = vmax.f32 %v197_v30, %v198_v38 }
 0x100   :  { %v166_v45 = vmax.f32 %v164_v33, %v165_v39  ;;  %v174_v46 = vmax.f32 %v172_v34, %v173_v40  ;;  %v183_v47 = vmax.f32 %v181_v36, %v182_v41  ;;  %v209_v53 = vmax.f32 %v207_v35, %v208_v42 }
 0x101   :  { %v192_v48 = vrot.slane %v191_v43, 2  ;;  %v200_v49 = vrot.slane %v199_v44, 2 }
 0x102   :  { %v167_v50 = vrot.slane %v166_v45, 1  ;;  %v175_v51 = vrot.slane %v174_v46, 1  ;;  %v184_v52 = vrot.slane %v183_v47, 2  ;;  %v210_v62 = vrot.slane %v209_v53, 1 }
 0x103   :  { %v193_v54 = vmax.f32 %v191_v43, %v192_v48  ;;  %v201_v55 = vmax.f32 %v199_v44, %v200_v49 }
 0x104   :  { %v185_v56 = vmax.f32 %v183_v47, %v184_v52  ;;  %v168_v57 = vmax.f32 %v166_v45, %v167_v50  ;;  %v176_v58 = vmax.f32 %v174_v46, %v175_v51  ;;  %v211_v4 = vmax.f32 %v209_v53, %v210_v62 }
 0x105   :  { %v194_v59 = vrot.slane %v193_v54, 1  ;;  %v202_v61 = vrot.slane %v201_v55, 1 }
 0x106   :  { %v186_v60 = vrot.slane %v185_v56, 1  ;;  %v213_v0 = vsel %vm212_vm8, %v168_v57, %v176_v58 }
 0x107   :  { %v195_v1 = vmax.f32 %v193_v54, %v194_v59  ;;  %v203_v2 = vmax.f32 %v201_v55, %v202_v61 }
 0x108   :  { %v187_v63 = vmax.f32 %v185_v56, %v186_v60 }
 0x10a   :  { %v215_v3 = vsel %vm214_vm9, %v213_v0, %v187_v63 }
 0x10b   :  { %v217_v5 = vsel %vm216_vm10, %v215_v3, %v195_v1 }
 0x10c   :  { %v219_v7 = vsel %vm218_vm11, %v217_v5, %v203_v2 }
 0x10d   :  { %v221_v8 = vsel %vm220_vm12, %v219_v7, %v211_v4 }
 0x10e   :  { %v229_v9 = vadd.f32 %v262_v6, %v221_v8 }
 0x110   :  { %297 = vtanh.f32 %v229_v9 }
 0x11a   :  { %v298_v10 = vpop.eup %297 }
 0x11b   :  { %232 = vst.msk [vmem:[#allocation2] sm:$0x3f] %vm231_vm13, %v298_v10 }
 0x11c   :  { %310 = shalt.err (!%p307_p4)
}
 0x11d   :  { %s311_s2 = scalar_lea.hbm %s399_s3, 128 }
 0x11e   :  { %p312_p5 = scmp.ne.s32.totalorder %s399_s3, %s311_s2  ;;  %p315_p6 = scmp.lt.u32.totalorder %s311_s2, %s399_s3 }
 0x120   :  { %p317_p7 = pnand %p315_p6, %p312_p5 }
 0x122   :  { %320 = shalt.err (!%p317_p7)
}
 0x123   :  { %242 = dma.vmem_to_hbm [thread:$0]  %s240_s10, 128, %s399_s3, [#allocation3]  }
 0x124   :  { %321 = dma.done.wait [#allocation3], 128  }
 0x125   :  { %322 = vsyncadd [#allocation3], 4294967168 }
 0x126   :  { %246 = vsyncpa [#allocation3], 1 }

</bundles_post_ra>
